<compile_context>
chip_gen: v6e
topology: v6e:2x2x1
jax: 0.10.0
libtpu: 0.0.40
codegen_flags: <defaults>
</compile_context>

<pallas_src>
import functools

import numpy as np
import jax
import jax.numpy as jnp
from jax.experimental import pallas as pl
from jax.experimental.pallas import tpu as pltpu


# ----------------------------------------------------------------------------
# small helpers
# ----------------------------------------------------------------------------
def _round_up(x, m):
    return ((x + m - 1) // m) * m


def _choose_tm(M):
    # Large M tiles (tiling sweep: 128 -> 512 moves mem-bound kernels to ~85%
    # of HBM roofline); padded M keeps the grid exact.  At real 384x384 inputs
    # this yields 72 even tiles for the two v7x TensorCores.
    return min(512, _round_up(M, 128))


def _pad_cols(a, m_pad):
    m = a.shape[1]
    return a if m == m_pad else jnp.pad(a, ((0, 0), (0, m_pad - m)))


# ----------------------------------------------------------------------------
# Pallas kernels
# ----------------------------------------------------------------------------
def _conv_mm_kernel(p_ref, w_ref, b_ref, o_ref, *, relu):
    """Lane-dense conv-as-matmul: o(O, tm) = act(W(O,K) @ P(K,tm) + b(O,1))."""
    acc = jnp.dot(w_ref[...], p_ref[...], preferred_element_type=jnp.float32)
    acc = acc + b_ref[...]                     # (O,1) broadcast over lanes
    if relu:
        acc = jnp.maximum(acc, 0.0)
    o_ref[...] = acc.astype(o_ref.dtype)       # single cast on store (bf16 ok)


def _fused_head_kernel(p_ref, w2_ref, b2_ref, w3_ref, b3_ref, o_ref):
    """Fused conv2(3x3,ReLU) + conv3(1x1, non_negative ReLU) -> (1, tm) depth row."""
    h = jnp.dot(w2_ref[...], p_ref[...], preferred_element_type=jnp.float32)  # (F, tm)
    h = jnp.maximum(h + b2_ref[...], 0.0)
    d = jnp.dot(w3_ref[...], h, preferred_element_type=jnp.float32)           # (1, tm)
    o_ref[...] = jnp.maximum(d + b3_ref[...], 0.0)


def _bicubic_kernel(wy_ref, x_ref, wxt_ref, o_ref):
    """One (batch, Hout-tile) of the separable bicubic: o = Wy_tile @ x[b] @ Wx^T."""
    t = jnp.dot(wy_ref[...], x_ref[0], preferred_element_type=jnp.float32)     # (th, Win)
    o_ref[0] = jnp.dot(t, wxt_ref[...], preferred_element_type=jnp.float32)    # (th, Wout)


# ----------------------------------------------------------------------------
# pallas_call wrappers
# ----------------------------------------------------------------------------
def _conv_matmul(patches, w_flat, b, *, relu, out_dtype=jnp.float32):
    """patches:(K,M) bf16, w_flat:(O,K) bf16, b:(O,) f32 -> (O, M) out_dtype."""
    K, M = patches.shape
    O = w_flat.shape[0]
    tm = _choose_tm(M)
    m_pad = _round_up(M, tm)
    p = _pad_cols(patches, m_pad)
    out = pl.pallas_call(
        functools.partial(_conv_mm_kernel, relu=relu),
        out_shape=jax.ShapeDtypeStruct((O, m_pad), out_dtype),
        grid=(m_pad // tm,),
        in_specs=[
            pl.BlockSpec((K, tm), lambda i: (0, i)),
            pl.BlockSpec((O, K), lambda i: (0, 0)),    # weight resident
            pl.BlockSpec((O, 1), lambda i: (0, 0)),    # bias resident
        ],
        out_specs=pl.BlockSpec((O, tm), lambda i: (0, i)),
        compiler_params=pltpu.CompilerParams(dimension_semantics=("parallel",)),
    )(p, w_flat, b.reshape(O, 1).astype(jnp.float32))
    return out[:, :M]


def _fused_head(patches, w2_flat, b2, w3_flat, b3):
    """Fused conv2+conv3: patches:(K,M) bf16 -> depth (1, M) f32."""
    K, M = patches.shape
    F = w2_flat.shape[0]
    tm = _choose_tm(M)
    m_pad = _round_up(M, tm)
    p = _pad_cols(patches, m_pad)
    out = pl.pallas_call(
        _fused_head_kernel,
        out_shape=jax.ShapeDtypeStruct((1, m_pad), jnp.float32),
        grid=(m_pad // tm,),
        in_specs=[
            pl.BlockSpec((K, tm), lambda i: (0, i)),
            pl.BlockSpec((F, K), lambda i: (0, 0)),
            pl.BlockSpec((F, 1), lambda i: (0, 0)),
            pl.BlockSpec((1, F), lambda i: (0, 0)),
            pl.BlockSpec((1, 1), lambda i: (0, 0)),
        ],
        out_specs=pl.BlockSpec((1, tm), lambda i: (0, i)),
        compiler_params=pltpu.CompilerParams(dimension_semantics=("parallel",)),
    )(p, w2_flat, b2.reshape(F, 1).astype(jnp.float32),
      w3_flat.astype(jnp.float32), b3.reshape(1, 1).astype(jnp.float32))
    return out[:, :M]


def _bicubic_upsample(pred, wy, wx):
    """pred:(B,Hin,Win) f32 -> (B,1,Hout,Wout), PyTorch bicubic align_corners=False."""
    B, Hin, Win = pred.shape
    Hout, Wout = wy.shape[0], wx.shape[0]
    th = 128 if Hout >= 128 else _round_up(Hout, 8)
    hp = _round_up(Hout, th)
    wy_p = jnp.pad(wy.astype(jnp.float32), ((0, hp - Hout), (0, 0)))
    out = pl.pallas_call(
        _bicubic_kernel,
        out_shape=jax.ShapeDtypeStruct((B, hp, Wout), jnp.float32),
        grid=(B, hp // th),
        in_specs=[
            pl.BlockSpec((th, Hin), lambda b, h: (h, 0)),
            pl.BlockSpec((1, Hin, Win), lambda b, h: (b, 0, 0)),   # DMA once per batch
            pl.BlockSpec((Win, Wout), lambda b, h: (0, 0)),
        ],
        out_specs=pl.BlockSpec((1, th, Wout), lambda b, h: (b, h, 0)),
        compiler_params=pltpu.CompilerParams(
            dimension_semantics=("parallel", "parallel")),
    )(wy_p, pred.astype(jnp.float32), wx.T.astype(jnp.float32))
    return out[:, None, :Hout, :]


# ----------------------------------------------------------------------------
# Glue: channel-major im2col (no layout transposes), bicubic weight matrices
# ----------------------------------------------------------------------------
def _patches_cm(x_cbhw, kh, kw, stride, pad):
    """x:(C,B,H,W) -> (C*kh*kw, B*Ho*Wo), K order (c, kh, kw) to match torch weights."""
    C, B, H, W = x_cbhw.shape
    xp = jnp.pad(x_cbhw, ((0, 0), (0, 0), (pad, pad), (pad, pad)))
    Ho = (H + 2 * pad - kh) // stride + 1
    Wo = (W + 2 * pad - kw) // stride + 1
    slabs = []
    for i in range(kh):
        for j in range(kw):
            slabs.append(xp[:, :, i:i + stride * Ho:stride, j:j + stride * Wo:stride])
    p = jnp.stack(slabs, axis=1)                      # (C, kh*kw, B, Ho, Wo)
    return p.reshape(C * kh * kw, B * Ho * Wo), Ho, Wo


@functools.lru_cache(maxsize=8)
def _bicubic_weight_matrix(in_size, out_size, a=-0.75):
    """(out_size, in_size) matrix matching torch upsample_bicubic2d (half-pixel, clamped)."""
    def cubic(x):
        x = abs(x)
        if x <= 1.0:
            return (a + 2.0) * x**3 - (a + 3.0) * x**2 + 1.0
        if x < 2.0:
            return a * x**3 - 5.0 * a * x**2 + 8.0 * a * x - 4.0 * a
        return 0.0

    mat = np.zeros((out_size, in_size), dtype=np.float32)
    scale = in_size / out_size
    for o in range(out_size):
        real = (o + 0.5) * scale - 0.5
        i0 = int(np.floor(real))
        t = real - i0
        for k in range(-1, 3):
            w = cubic(k - t)
            idx = min(max(i0 + k, 0), in_size - 1)
            mat[o, idx] += w
    return jnp.asarray(mat)


# ----------------------------------------------------------------------------
# MiDaSInference forward
# ----------------------------------------------------------------------------
def init_params(key):
    k1, k2, k3, k4, k5, k6 = jax.random.split(key, 6)
    F = 32  # synthetic feature width for the depth head
    return {
        "w1": jax.random.normal(k1, (F, 3, 3, 3), jnp.float32) * 0.1,
        "b1": jax.random.normal(k2, (F,), jnp.float32) * 0.01,
        "w2": jax.random.normal(k3, (F, F, 3, 3), jnp.float32) * 0.05,
        "b2": jax.random.normal(k4, (F,), jnp.float32) * 0.01,
        "w3": jax.random.normal(k5, (1, F, 1, 1), jnp.float32) * 0.1,
        "b3": jax.random.normal(k6, (1,), jnp.float32) * 0.01,
    }


def midas_inference_forward(params, x):
    """x: (B, 3, H, W) float32 NCHW -> (B, 1, H, W) depth (non-negative)."""
    B, C, H, W = x.shape
    F = params["w1"].shape[0]

    # one-time cheap (C=3) transpose to channel-major; everything after stays (C,B,H,W)
    x_cm = jnp.transpose(x, (1, 0, 2, 3)).astype(jnp.bfloat16)

    # conv1: stride-2 stem (half-resolution prediction, like a backbone).
    # The kernel writes the activation directly in bf16 (one HBM pass, no
    # separate cast op) since the next im2col consumes bf16 anyway.
    p1, H1, W1 = _patches_cm(x_cm, 3, 3, 2, 1)                      # (27, B*H1*W1) bf16
    w1 = params["w1"].reshape(F, 27).astype(jnp.bfloat16)
    h1 = _conv_matmul(p1, w1, params["b1"], relu=True,
                      out_dtype=jnp.bfloat16)                       # (F, B*H1*W1) bf16
    h1 = h1.reshape(F, B, H1, W1)                                   # free reshape

    # conv2 (3x3, ReLU) fused with conv3 (1x1, non_negative ReLU)
    p2, _, _ = _patches_cm(h1, 3, 3, 1, 1)                          # (F*9, B*H1*W1) bf16
    w2 = params["w2"].reshape(F, F * 9).astype(jnp.bfloat16)
    w3 = params["w3"].reshape(1, F)
    d = _fused_head(p2, w2, params["b2"], w3, params["b3"])         # (1, B*H1*W1) f32
    pred = d.reshape(B, H1, W1)                                     # DPT squeezes dim 1

    # prediction.unsqueeze(1) + bicubic interpolate to x.shape[2:], align_corners=False
    wy = _bicubic_weight_matrix(H1, H)
    wx = _bicubic_weight_matrix(W1, W)
    out = _bicubic_upsample(pred, wy, wx)                           # (B,1,H,W)
    assert out.shape == (B, 1, H, W)
    return out


# ----------------------------------------------------------------------------
# Pure-JAX f32 reference (sanity check of the Pallas path)
# ----------------------------------------------------------------------------
def _reference_forward(params, x):
    def conv(x, w, b, stride, pad, relu):
        y = jax.lax.conv_general_dilated(
            x, w, window_strides=(stride, stride), padding=((pad, pad), (pad, pad)),
            dimension_numbers=("NCHW", "OIHW", "NCHW"))
        y = y + b[None, :, None, None]
        return jnp.maximum(y, 0.0) if relu else y

    B, C, H, W = x.shape
    h = conv(x, params["w1"], params["b1"], 2, 1, True)
    h = conv(h, params["w2"], params["b2"], 1, 1, True)
    d = conv(h, params["w3"], params["b3"], 1, 0, True)
    pred = d[:, 0]
    wy = _bicubic_weight_matrix(pred.shape[1], H)
    wx = _bicubic_weight_matrix(pred.shape[2], W)
    out = jnp.einsum("oh,bhw,pw->bop", wy, pred, wx)[:, None]
    return out


if __name__ == "__main__":
    key = jax.random.PRNGKey(0)
    pkey, xkey = jax.random.split(key)
    params = init_params(pkey)

    # MiDaS consumes 3-channel (normalized) images.
    x = jax.random.normal(xkey, (2, 3, 32, 32), jnp.float32)

    out = midas_inference_forward(params, x)
    out = jax.block_until_ready(out)
    assert out.shape == (2, 1, 32, 32)

    # tolerance loosened vs f32 reference because conv operands are fed to the
    # MXU in bfloat16 (f32 accumulation) and the stem activation is stored bf16.
    ref = _reference_forward(params, x)
    np.testing.assert_allclose(np.asarray(out), np.asarray(ref), rtol=2e-2, atol=2e-2)

    print("KERNEL_OK")
</pallas_src>

<mosaic_0001>
module attributes {stable_mosaic.version = 11 : i64} {
  func.func @_conv_mm_kernel(%arg0: i32, %arg1: memref<27x512xbf16, #tpu.memory_space<vmem>>, %arg2: memref<32x27xbf16, #tpu.memory_space<vmem>>, %arg3: memref<32x1xf32, #tpu.memory_space<vmem>>, %arg4: memref<32x512xbf16, #tpu.memory_space<vmem>>) attributes {dimension_semantics = [#tpu.dimension_semantics<parallel>], iteration_bounds = array<i64: 1>, scalar_prefetch = 0 : i64, scratch_operands = 0 : i64, tpu.core_type = #tpu.core_type<tc>, window_params = [{transform_indices = @transform_0, window_bounds = array<i64: 27, 512>}, {pipeline_mode = #tpu.pipeline_mode<synchronous>, transform_indices = @transform_1, window_bounds = array<i64: 32, 27>}, {pipeline_mode = #tpu.pipeline_mode<synchronous>, transform_indices = @transform_2, window_bounds = array<i64: 32, 1>}, {transform_indices = @transform_3, window_bounds = array<i64: 32, 512>}]} {
    %c0 = arith.constant 0 : index
    %c0_0 = arith.constant 0 : index
    %0 = vector.load %arg2[%c0, %c0_0] : memref<32x27xbf16, #tpu.memory_space<vmem>>, vector<32x27xbf16>
    %c0_1 = arith.constant 0 : index
    %c0_2 = arith.constant 0 : index
    %1 = vector.load %arg1[%c0_1, %c0_2] : memref<27x512xbf16, #tpu.memory_space<vmem>>, vector<27x512xbf16>
    %cst = arith.constant dense<0.000000e+00> : vector<32x512xf32>
    %2 = tpu.matmul %0, %1, %cst {dimension_numbers = #tpu.dot_dimension_numbers<[1], [0], [0], [1], [0, 0, 1, 1], [], []>} : vector<32x27xbf16>, vector<27x512xbf16>, vector<32x512xf32> -> vector<32x512xf32>
    %c0_3 = arith.constant 0 : index
    %c0_4 = arith.constant 0 : index
    %3 = vector.load %arg3[%c0_3, %c0_4] : memref<32x1xf32, #tpu.memory_space<vmem>>, vector<32x1xf32>
    %4 = vector.broadcast %3 : vector<32x1xf32> to vector<32x512xf32>
    %5 = arith.addf %2, %4 : vector<32x512xf32>
    %cst_5 = arith.constant 0.000000e+00 : f32
    %6 = vector.broadcast %cst_5 : f32 to vector<32x512xf32>
    %7 = arith.maximumf %5, %6 : vector<32x512xf32>
    %8 = arith.truncf %7 : vector<32x512xf32> to vector<32x512xbf16>
    %c0_6 = arith.constant 0 : index
    %c0_7 = arith.constant 0 : index
    %9 = vector.load %arg4[%c0_6, %c0_7] : memref<32x512xbf16, #tpu.memory_space<vmem>>, vector<32x512xbf16>
    tpu.vector_store %arg4[%c0_6, %c0_7], %8 {strides = array<i32>} : memref<32x512xbf16, #tpu.memory_space<vmem>>, vector<32x512xbf16>,
    return
  }
  func.func @transform_0(%arg0: i32) -> (i32, i32) {
    %c0_i32 = arith.constant 0 : i32
    %c0_i32_0 = arith.constant 0 : i32
    return %c0_i32, %arg0 : i32, i32
  }
  func.func @transform_1(%arg0: i32) -> (i32, i32) {
    %c0_i32 = arith.constant 0 : i32
    %c0_i32_0 = arith.constant 0 : i32
    %c0_i32_1 = arith.constant 0 : i32
    return %c0_i32, %c0_i32_0 : i32, i32
  }
  func.func @transform_2(%arg0: i32) -> (i32, i32) {
    %c0_i32 = arith.constant 0 : i32
    %c0_i32_0 = arith.constant 0 : i32
    %c0_i32_1 = arith.constant 0 : i32
    return %c0_i32, %c0_i32_0 : i32, i32
  }
  func.func @transform_3(%arg0: i32) -> (i32, i32) {
    %c0_i32 = arith.constant 0 : i32
    %c0_i32_0 = arith.constant 0 : i32
    return %c0_i32, %arg0 : i32, i32
  }
}

</mosaic_0001>

<bundles_post_ra>
// kernel: tpu_custom_call.1
= control target key start
LH: loop header
LB: loop body
LE: loop exit
PB: predicated region body
PF: predicated region fallthrough
CT: control target
= control target key end

     0   :  { %8 = vsyncpa [#allocation3], 0  ;;  %s482_s0 = inlined_call_operand.hbm [shape: bf16[27,512], index: 0, kind: input, shape index: {}]   ;;  %s483_s1 = inlined_call_operand.vmem [shape: bf16[32,27], index: 1, kind: input, shape index: {}]   ;;  %s484_s2 = inlined_call_operand.vmem [shape: f32[32,1], index: 2, kind: input, shape index: {}]   ;;  %s485_s3 = inlined_call_operand.hbm [shape: bf16[32,512], index: 3, kind: output, shape index: {}]  }
   0x1   :  { %9 = vsyncpa [#allocation4], 0  ;;  %s426_s12 = smov [#allocation2]  }
   0x2   :  { %s15_s13 = sshll.u32 %s426_s12, 4  ;;  %s16_s13 = int_to_ptr.vmem [resolvable:$true] %s15_s13 }
   0x3   :  { %s390_s14 = scalar_lea.vmem %s16_s13, 1024  ;;  %p395_p1 = scmp.lt.s32.totalorder %s16_s13, %s16_s13 }
   0x4   :  { %p391_p0 = scmp.ne.s32.totalorder %s16_s13, %s390_s14  ;;  %p396_p2 = scmp.lt.s32.totalorder %s390_s14, %s390_s14 }
   0x6   :  { %p397_p3 = por %p396_p2, %p395_p1 }
   0x8   :  { %p398_p4 = pnand %p397_p3, %p391_p0 }
   0xa   :  { %401 = shalt.err (!%p398_p4)
}
   0xb   :  { %s427_s15 = smov 256   ;;  %s428_s16 = smov 16  }
   0xc   :  { %21 = dma.hbm_to_vmem [thread:$0]  %s482_s0, 1024, %s16_s13, [#allocation3], %s427_s15, %s427_s15, %s428_s16  }
   0xd   :  { %422 = dma.done.wait [#allocation3], 1024  }
   0xe   :  { %423 = vsyncadd [#allocation3], 4294966272  ;;  %vm119_vm0 = vcmask 1044480   ;;  %v429_v0 = vmov 0   ;;  %vm120_vm1 = vcmask 1045504   ;;  %v430_v1 = vmov 65535  }
   0xf   :  { %167 = vmatprep.mubr.bf16.mxu0 %v429_v0  ;;  %220 = vmatprep.mubr.bf16.mxu1 %v429_v0  ;;  %v121_v2 = vsel %vm119_vm0, 4294967295, %v430_v1  ;;  %v368_v4 = vld [vmem:[#allocation2 + $0x24] ss:$16 sps:$4 sm:$0x3f]   ;;  %v376_v13 = vld [vmem:[#allocation2 + $0xc] ss:$16 sps:$4 sm:$0xff]  }
  0x10   :  { %366 = vset.pattern.permute.xlu0 %v429_v0  ;;  %367 = vset.pattern.permute.xlu1 %v429_v0  ;;  %v122_v3 = vsel %vm120_vm1, %v121_v2, 0  ;;  %v370_v5 = vld [vmem:[#allocation2 + $0x2c] ss:$16 sps:$4 sm:$0x3f]   ;;  %v374_v10 = vld [vmem:[#allocation2 + $0x4] ss:$16 sps:$4 sm:$0xff]  }
  0x11   :  { %v127_v6 = vand.u32 %v368_v4, %v122_v3  ;;  %v372_v7 = vld [vmem:[#allocation2 + $0x20] ss:$16 sps:$4 sm:$0x3f]   ;;  %v373_v8 = vld [vmem:[#allocation2 + $0x28] ss:$16 sps:$4 sm:$0x3f]   ;;  %v133_v9 = vand.u32 %v370_v5, %v122_v3 }
  0x12   :  { %v124_v11 = vand.u32 %v372_v7, %v122_v3  ;;  %v130_v12 = vand.u32 %v373_v8, %v122_v3  ;;  %v378_v14 = vld [vmem:[#allocation2] ss:$16 sps:$4 sm:$0xff]   ;;  %v379_v15 = vld [vmem:[#allocation2 + $0x8] ss:$16 sps:$4 sm:$0xff]   ;;  %vm112_vm2 = vcmask 220160  }
  0x13   :  { %147 = vmatprep.subr.bf16.mxu0 %v127_v6  ;;  %200 = vmatprep.subr.bf16.mxu1 %v133_v9  ;;  %v42_v16 = vld [vmem:[%s484_s2] sm:$0xff]  ;;  %v44_v17 = vld [vmem:[%s484_s2 + $0x10] sm:$0xff]  ;;  %v43_v19 = vld [vmem:[%s484_s2 + $0x8] sm:$0xff] }
  0x14   :  { %148 = vmatpush1.bf16.msra.mxu0 %v124_v11  ;;  %201 = vmatpush1.bf16.msra.mxu1 %v130_v12  ;;  %v380_v18 = vld [vmem:[%s483_s1] sm:$0xff]   ;;  %v45_v20 = vld [vmem:[%s484_s2 + $0x18] sm:$0xff]  ;;  %v381_v21 = vld [vmem:[%s483_s1 + $0x8] sm:$0xff]   ;;  %s431_s1 = smov [#allocation5]  }
  0x15   :  { %149 = vmatprep.subr.bf16.mxu0 %v374_v10  ;;  %202 = vmatprep.subr.bf16.mxu1 %v376_v13  ;;  %s318_s2 = sshll.u32 %s431_s1, 4  ;;  %s319_s2 = int_to_ptr.vmem [resolvable:$true] %s318_s2 }
  0x16   :  { %48 = vperm.xlu0 %366, %v42_v16   ;;  %58 = vperm.xlu1 %367, %v44_v17   ;;  %s402_s30 = scalar_lea.vmem %s319_s2, 1024  ;;  %p407_p6 = scmp.lt.s32.totalorder %s319_s2, %s319_s2 }
  0x17   :  { %p403_p5 = scmp.ne.s32.totalorder %s319_s2, %s402_s30  ;;  %p408_p7 = scmp.lt.s32.totalorder %s402_s30, %s402_s30 }
  0x18   :  { %150 = vmatpush1.bf16.msra.mxu0 %v378_v14  ;;  %203 = vmatpush1.bf16.msra.mxu1 %v379_v15 }
  0x19   :  { %p409_p8 = por %p408_p7, %p407_p6 }
  0x1a   :  { %53 = vperm.xlu0 %366, %v43_v19   ;;  %63 = vperm.xlu1 %367, %v45_v20  }
  0x1b   :  { %340 = vmatmul.mubr.msk.bf16.vlgmr.msra.gmra.mxu0 %vm112_vm2, %v380_v18  ;;  %342 = vmatmul.mubr.msk.bf16.vlgmr.msra.gmra.mxu1 %vm112_vm2, %v380_v18  ;;  %p410_p9 = pnand %p409_p8, %p403_p5 }
  0x1c   :  { %177 = vmatprep.mubr.bf16.mxu0 %v429_v0  ;;  %230 = vmatprep.mubr.bf16.mxu1 %v429_v0 }
  0x23   :  { %341 = vmatmul.mubr.msk.bf16.gmra.mxu0 %vm112_vm2, %v381_v21  ;;  %343 = vmatmul.mubr.msk.bf16.gmra.mxu1 %vm112_vm2, %v381_v21 }
  0x91   :  { %v49_v22 = vpop.permute.xlu0 %48  ;;  %v59_v44 = vpop.permute.xlu1 %58 }
  0x95   :  { %v54_v31 = vpop.permute.xlu0 %53  ;;  %v64_v1 = vpop.permute.xlu1 %63 }
  0xdb   :  { %v169_v23 = vpop.f32.mrf.mxu0  ;;  %v222_v24 = vpop.f32.mrf.mxu1 }
  0xdc   :  { %v170_v25 = vadd.f32 %v169_v23, %v49_v22  ;;  %v223_v26 = vadd.f32 %v222_v24, %v49_v22 }
  0xdd   :  { %v171_v27 = vpop.f32.mrf.mxu0  ;;  %v224_v28 = vpop.f32.mrf.mxu1 }
  0xde   :  { %v172_v29 = vadd.f32 %v171_v27, %v49_v22  ;;  %v225_v30 = vadd.f32 %v224_v28, %v49_v22  ;;  %v241_v34 = vmax.f32 %v170_v25, 0.0  ;;  %v243_v35 = vmax.f32 %v223_v26, 0.0 }
  0xdf   :  { %v173_v32 = vpop.f32.mrf.mxu0  ;;  %v226_v33 = vpop.f32.mrf.mxu1 }
  0xe0   :  { %v242_v36 = vmax.f32 %v172_v29, 0.0  ;;  %v244_v37 = vmax.f32 %v225_v30, 0.0  ;;  %v174_v38 = vadd.f32 %v173_v32, %v54_v31  ;;  %v227_v39 = vadd.f32 %v226_v33, %v54_v31 }
  0xe1   :  { %v175_v40 = vpop.f32.mrf.mxu0  ;;  %v228_v41 = vpop.f32.mrf.mxu1 }
  0xe2   :  { %v352_v42 = vpack.c.bf16 %v242_v36, %v241_v34  ;;  %v353_v43 = vpack.c.bf16 %v244_v37, %v243_v35  ;;  %v176_v45 = vadd.f32 %v175_v40, %v54_v31  ;;  %v229_v46 = vadd.f32 %v228_v41, %v54_v31 }
  0xe3   :  { %v179_v47 = vpop.f32.mrf.mxu0  ;;  %v232_v48 = vpop.f32.mrf.mxu1  ;;  %v245_v51 = vmax.f32 %v174_v38, 0.0  ;;  %v247_v52 = vmax.f32 %v227_v39, 0.0 }
  0xe4   :  { %305 = vst [vmem:[#allocation5] sm:$0xff] %v352_v42  ;;  %306 = vst [vmem:[#allocation5 + $0x8] sm:$0xff] %v353_v43  ;;  %v180_v49 = vadd.f32 %v179_v47, %v59_v44  ;;  %v233_v50 = vadd.f32 %v232_v48, %v59_v44  ;;  %v246_v53 = vmax.f32 %v176_v45, 0.0  ;;  %v248_v54 = vmax.f32 %v229_v46, 0.0 }
  0xe5   :  { %v181_v55 = vpop.f32.mrf.mxu0  ;;  %v234_v56 = vpop.f32.mrf.mxu1 }
  0xe6   :  { %v182_v57 = vadd.f32 %v181_v55, %v59_v44  ;;  %v235_v58 = vadd.f32 %v234_v56, %v59_v44  ;;  %v354_v59 = vpack.c.bf16 %v246_v53, %v245_v51  ;;  %v355_v60 = vpack.c.bf16 %v248_v54, %v247_v52 }
  0xe7   :  { %v183_v61 = vpop.f32.mrf.mxu0  ;;  %v236_v62 = vpop.f32.mrf.mxu1  ;;  %v249_v63 = vmax.f32 %v180_v49, 0.0  ;;  %v251_v0 = vmax.f32 %v233_v50, 0.0 }
  0xe8   :  { %v250_v2 = vmax.f32 %v182_v57, 0.0  ;;  %v252_v3 = vmax.f32 %v235_v58, 0.0  ;;  %307 = vst [vmem:[#allocation5 + $0x10] sm:$0xff] %v354_v59  ;;  %308 = vst [vmem:[#allocation5 + $0x18] sm:$0xff] %v355_v60  ;;  %v184_v4 = vadd.f32 %v183_v61, %v64_v1  ;;  %v237_v5 = vadd.f32 %v236_v62, %v64_v1 }
  0xe9   :  { %v185_v6 = vpop.f32.mrf.mxu0  ;;  %v238_v7 = vpop.f32.mrf.mxu1 }
  0xea   :  { %v356_v8 = vpack.c.bf16 %v250_v2, %v249_v63  ;;  %v357_v9 = vpack.c.bf16 %v252_v3, %v251_v0  ;;  %v186_v10 = vadd.f32 %v185_v6, %v64_v1  ;;  %v239_v11 = vadd.f32 %v238_v7, %v64_v1 }
  0xeb   :  { %v253_v12 = vmax.f32 %v184_v4, 0.0  ;;  %v255_v13 = vmax.f32 %v237_v5, 0.0 }
  0xec   :  { %309 = vst [vmem:[#allocation5 + $0x20] sm:$0xff] %v356_v8  ;;  %310 = vst [vmem:[#allocation5 + $0x28] sm:$0xff] %v357_v9  ;;  %v254_v14 = vmax.f32 %v186_v10, 0.0  ;;  %v256_v15 = vmax.f32 %v239_v11, 0.0 }
  0xee   :  { %v358_v16 = vpack.c.bf16 %v254_v14, %v253_v12  ;;  %v359_v17 = vpack.c.bf16 %v256_v15, %v255_v13 }
  0xf0   :  { %311 = vst [vmem:[#allocation5 + $0x30] sm:$0xff] %v358_v16  ;;  %312 = vst [vmem:[#allocation5 + $0x38] sm:$0xff] %v359_v17 }
  0xf1   :  { %413 = shalt.err (!%p410_p9)
}
  0xf2   :  { %324 = dma.vmem_to_hbm [thread:$0]  %s319_s2, 1024, %s485_s3, [#allocation4], %s427_s15, %s427_s15, %s428_s16  }
  0xf3   :  { %424 = dma.done.wait [#allocation4], 1024  }
  0xf4   :  { %425 = vsyncadd [#allocation4], 4294966272 }
  0xf5   :  { %328 = vsyncpa [#allocation3], 1 }
  0xf6   :  { %329 = vsyncpa [#allocation4], 1 }

</bundles_post_ra>
